<compile_context>
chip_gen: v7x
topology: tpu7x:2x2x1
jax: 0.10.0
libtpu: 0.0.40
codegen_flags: <defaults>
</compile_context>

<pallas_src>
import math

import jax
import jax.numpy as jnp
from jax.experimental import pallas as pl
from jax.experimental.pallas import tpu as pltpu


# ----------------------------------------------------------------------------
# Kernel
# ----------------------------------------------------------------------------
def _mlp_kernel(x_ref, w1_ref, b1_ref, w2_ref, b2_ref, o_ref):
    # Cast x to the compute dtype in-kernel (no-op when compute dtype == x dtype),
    # so the wrapper never writes a separate bf16 copy of the activations.
    x = x_ref[...].astype(w1_ref.dtype)
    # Hidden layer: Linear + ReLU. MXU matmul with f32 accumulation.
    h = jnp.dot(x, w1_ref[...], preferred_element_type=jnp.float32)
    h = jnp.maximum(h + b1_ref[...], 0.0)          # activation_function (ReLU)
    # (batch_norm_layers is empty and dropout is None -> nothing else here)
    # Output layer: Linear + ReLU (is_output_activation=True).
    y = jnp.dot(h.astype(w2_ref.dtype), w2_ref[...],
                preferred_element_type=jnp.float32)
    o_ref[...] = jnp.maximum(y + b2_ref[...], 0.0).astype(o_ref.dtype)


# ----------------------------------------------------------------------------
# Helpers: alignment / hardware defaults / tiling heuristics
# ----------------------------------------------------------------------------
def _round_up(x, m):
    return ((x + m - 1) // m) * m


def _hw_defaults():
    """Generation-aware defaults (tile size, TC count, VMEM budget)."""
    kind = ""
    try:
        kind = jax.devices()[0].device_kind.lower()
    except Exception:
        pass
    is_v7 = "v7" in kind
    is_v5e = "v5" in kind and ("lite" in kind or "v5e" in kind)

    # Physical VMEM (fallback by generation); prefer the runtime query.
    vmem_cap = (64 if is_v7 else 128) * 1024 * 1024
    try:
        vmem_cap = int(pltpu.get_tpu_info().vmem_capacity_bytes)
    except Exception:
        pass

    return {
        "is_v5e": is_v5e,
        "tensorcores": 2 if is_v7 else 1,
        # v7x: smaller batch tile (64 MiB VMEM, and we want >=2 grid steps for
        # the 2 TCs); v5e/v6e: 512-row tiles approach the HBM roofline.
        "block_b": 256 if is_v7 else 512,
        # Explicit VMEM budget with headroom below the physical capacity.
        "vmem_budget": min(vmem_cap * 3 // 4, 96 * 1024 * 1024),
        "prefer_256": not is_v5e,   # v6e/v7x MXU is 2x256^2; v5e is 4x128^2
    }


def _pad_feature(d, prefer_256):
    """Lane-dense feature padding: multiple of 128; 256 on v6e/v7x when the
    extra padding over 128-alignment is negligible (<= ~12.5%)."""
    p128 = _round_up(d, 128)
    if prefer_256:
        p256 = _round_up(d, 256)
        if p256 <= p128 + p128 // 8:
            return p256
    return p128


def _choose_block(B, row_align, block_cap, min_steps):
    """Pick (blk, B_pad): row-aligned tile, bounded padding waste, and (when the
    batch allows) >= min_steps grid steps so multi-TC chips (v7x) shard."""
    b_aligned = _round_up(B, row_align)
    blk = _round_up(min(block_cap, b_aligned), row_align)

    # Give multi-TC chips at least `min_steps` grid steps when possible.
    if min_steps > 1 and b_aligned > row_align:
        per_step = _round_up(-(-b_aligned // min_steps), row_align)
        blk = max(row_align, min(blk, per_step))

    # Bound batch-padding waste (~12.5%), with a 128-row floor so grid steps
    # stay DMA-efficient (per-step overhead ~0.35 us).
    floor = min(blk, max(row_align, 128))
    while blk > floor:
        waste = _round_up(B, blk) - B
        if waste <= max(B // 8, row_align):
            break
        blk = max(floor, _round_up(blk // 2, row_align))

    return blk, _round_up(B, blk)


# ----------------------------------------------------------------------------
# One-time parameter preparation (hoisted out of the forward call)
# ----------------------------------------------------------------------------
def prepare_mlp_params(w1, b1, w2, b2, *, compute_dtype=jnp.bfloat16,
                       prefer_256=None):
    """Pad + cast the weights/biases ONCE (at init).  mlp_forward then reads the
    prepared arrays directly, avoiding two full weight HBM passes per call.

    Shapes: w1 (d_in, d_hid), b1 (1, d_hid) or (d_hid,), w2 (d_hid, d_out),
            b2 (1, d_out) or (d_out,).
    Use compute_dtype=jnp.float32 if strict f32 parity is required.
    """
    if prefer_256 is None:
        prefer_256 = _hw_defaults()["prefer_256"]

    d_in, d_hid = w1.shape
    d_out = w2.shape[1]
    d_in_p = _pad_feature(d_in, prefer_256)
    d_hid_p = _pad_feature(d_hid, prefer_256)
    d_out_p = _pad_feature(d_out, prefer_256)

    def _pad2(a, rows, cols, dtype):
        a = a.reshape((-1, a.shape[-1])) if a.ndim == 2 else a.reshape(1, -1)
        if a.shape == (rows, cols) and a.dtype == dtype:
            return a
        return jnp.zeros((rows, cols), dtype).at[:a.shape[0], :a.shape[1]].set(
            a.astype(dtype))

    return {
        "w1": _pad2(w1, d_in_p, d_hid_p, compute_dtype),
        "b1": _pad2(b1, 1, d_hid_p, jnp.float32),     # biases added in f32
        "w2": _pad2(w2, d_hid_p, d_out_p, compute_dtype),
        "b2": _pad2(b2, 1, d_out_p, jnp.float32),
        "d_in": d_in, "d_out": d_out,
        "d_in_p": d_in_p, "d_hid_p": d_hid_p, "d_out_p": d_out_p,
    }


# ----------------------------------------------------------------------------
# Forward
# ----------------------------------------------------------------------------
def mlp_forward(x, params, *, block_b=None, out_dtype=jnp.bfloat16, x_buffers=3):
    """x: (B, d_in) in its natural dtype (cast to compute dtype happens in-kernel).
    params: output of prepare_mlp_params. Returns (B, d_out) in out_dtype."""
    B, d_in = x.shape
    assert d_in == params["d_in"], "x feature dim does not match prepared params"
    d_in_p, d_hid_p, d_out_p = params["d_in_p"], params["d_hid_p"], params["d_out_p"]
    d_out = params["d_out"]

    hw = _hw_defaults()
    if block_b is None:
        block_b = hw["block_b"]

    x_bytes = jnp.dtype(x.dtype).itemsize
    c_bytes = jnp.dtype(params["w1"].dtype).itemsize
    o_bytes = jnp.dtype(out_dtype).itemsize
    # 16-row alignment when any 16-bit tile is involved (full bf16 vregs).
    row_align = 16 if min(c_bytes, o_bytes, x_bytes) <= 2 else 8

    blk, B_pad = _choose_block(B, row_align, block_b, hw["tensorcores"])

    # --- VMEM footprint (weights resident + pipelined x/out tiles + f32 temps);
    #     shrink the batch tile if it would not fit the generation's budget.
    def _footprint(blk_):
        weights = (d_in_p * d_hid_p + d_hid_p * d_out_p) * c_bytes
        biases = (d_hid_p + d_out_p) * 4
        x_tile = blk_ * d_in_p * x_bytes * max(1, min(x_buffers, 3))
        o_tile = blk_ * d_out_p * o_bytes * 2
        temps = blk_ * (d_hid_p + d_out_p) * 4      # f32 intermediates
        return weights + biases + x_tile + o_tile + temps

    while _footprint(blk) > hw["vmem_budget"] and blk > row_align:
        blk = max(row_align, _round_up(blk // 2, row_align))
        B_pad = _round_up(B, blk)
    vmem_limit = int(min(max(2 * _footprint(blk), 16 * 1024 * 1024),
                         hw["vmem_budget"]))

    grid_steps = B_pad // blk

    # --- x: pad only when misaligned (keeps original dtype; no bf16 copy).
    if (B_pad, d_in_p) != (B, d_in):
        x_in = jnp.zeros((B_pad, d_in_p), x.dtype).at[:B, :d_in].set(x)
    else:
        x_in = x

    # Weights/biases are grid-invariant -> single-buffer them (resident in VMEM).
    def _const_spec(shape):
        return pl.BlockSpec(shape, lambda i: (0,) * len(shape),
                            pipeline_mode=pl.Buffered(1))

    # x is the only per-step DMA; give it deeper buffering when there are
    # multiple grid steps so its latency stays hidden behind the matmuls.
    n_x_buf = max(1, min(x_buffers, grid_steps, 3))

    out_p = pl.pallas_call(
        _mlp_kernel,
        out_shape=jax.ShapeDtypeStruct((B_pad, d_out_p), out_dtype),
        grid_spec=pl.GridSpec(
            grid=(grid_steps,),
            in_specs=[
                pl.BlockSpec((blk, d_in_p), lambda i: (i, 0),
                             pipeline_mode=pl.Buffered(n_x_buf)),   # x tile
                _const_spec((d_in_p, d_hid_p)),                     # W1 (resident)
                _const_spec((1, d_hid_p)),                          # b1
                _const_spec((d_hid_p, d_out_p)),                    # W2 (resident)
                _const_spec((1, d_out_p)),                          # b2
            ],
            out_specs=pl.BlockSpec((blk, d_out_p), lambda i: (i, 0)),
        ),
        compiler_params=pltpu.CompilerParams(
            # Batch axis is embarrassingly parallel -> v7x can shard the grid
            # steps across its 2 TensorCores.
            dimension_semantics=("parallel",),
            vmem_limit_bytes=vmem_limit,
        ),
    )(x_in, params["w1"], params["b1"], params["w2"], params["b2"])

    return out_p[:B, :d_out]


# ----------------------------------------------------------------------------
# PyTorch-equivalent initialisation
# ----------------------------------------------------------------------------
def _xavier_uniform(key, fan_in, fan_out):
    # nn.init.xavier_uniform_ : U(-a, a), a = sqrt(6 / (fan_in + fan_out))
    a = math.sqrt(6.0 / (fan_in + fan_out))
    # stored as (in, out) == W^T of the PyTorch (out, in) weight
    return jax.random.uniform(key, (fan_in, fan_out), jnp.float32, -a, a)


def _torch_default_bias(key, fan_in, fan_out):
    # nn.Linear default bias init: U(-1/sqrt(fan_in), 1/sqrt(fan_in))
    bound = 1.0 / math.sqrt(fan_in)
    return jax.random.uniform(key, (1, fan_out), jnp.float32, -bound, bound)


def init_mlp_params(key, dim_input, dim_hidden, dim_output):
    k1, k2, k3, k4 = jax.random.split(key, 4)
    w1 = _xavier_uniform(k1, dim_input, dim_hidden)
    b1 = _torch_default_bias(k2, dim_input, dim_hidden)
    w2 = _xavier_uniform(k3, dim_hidden, dim_output)
    b2 = _torch_default_bias(k4, dim_hidden, dim_output)
    return w1, b1, w2, b2


if __name__ == "__main__":
    # Small shapes consistent with the module: flat feature vectors in, MLP out.
    B, D_IN, D_HID, D_OUT = 8, 16, 32, 8

    key = jax.random.PRNGKey(0)
    kx, kp = jax.random.split(key)
    x = jax.random.normal(kx, (B, D_IN), jnp.float32)
    w1, b1, w2, b2 = init_mlp_params(kp, D_IN, D_HID, D_OUT)

    # One-time weight preparation (padding + bf16 cast), hoisted out of forward.
    params = prepare_mlp_params(w1, b1, w2, b2)

    out = mlp_forward(x, params)                 # bf16 output
    out = jax.block_until_ready(out)

    # Pure-JAX f32 reference of the module forward. Kernel uses bf16 operands /
    # bf16 output with f32 accumulation, so compare with loosened tolerance.
    # (prepare_mlp_params(compute_dtype=jnp.float32) + out_dtype=jnp.float32 is
    #  the strict-parity fallback.)
    h_ref = jnp.maximum(x @ w1 + b1, 0.0)
    y_ref = jnp.maximum(h_ref @ w2 + b2, 0.0)
    assert out.shape == (B, D_OUT)
    assert out.dtype == jnp.bfloat16
    out_f32 = out.astype(jnp.float32)
    assert jnp.allclose(out_f32, y_ref, atol=5e-2, rtol=5e-2), (
        float(jnp.max(jnp.abs(out_f32 - y_ref))))

    print("KERNEL_OK")
</pallas_src>

<mosaic_0001>
module attributes {stable_mosaic.version = 11 : i64} {
  func.func @_mlp_kernel(%arg0: i32, %arg1: memref<16x128xf32, #tpu.memory_space<vmem>>, %arg2: memref<128x128xbf16, #tpu.memory_space<vmem>>, %arg3: memref<1x128xf32, #tpu.memory_space<vmem>>, %arg4: memref<128x128xbf16, #tpu.memory_space<vmem>>, %arg5: memref<1x128xf32, #tpu.memory_space<vmem>>, %arg6: memref<16x128xbf16, #tpu.memory_space<vmem>>) attributes {dimension_semantics = [#tpu.dimension_semantics<parallel>], iteration_bounds = array<i64: 1>, scalar_prefetch = 0 : i64, scratch_operands = 0 : i64, tpu.core_type = #tpu.core_type<tc>, window_params = [{pipeline_mode = #tpu.pipeline_mode<synchronous>, transform_indices = @transform_0, window_bounds = array<i64: 16, 128>}, {pipeline_mode = #tpu.pipeline_mode<synchronous>, transform_indices = @transform_1, window_bounds = array<i64: 128, 128>}, {pipeline_mode = #tpu.pipeline_mode<synchronous>, transform_indices = @transform_2, window_bounds = array<i64: 1, 128>}, {pipeline_mode = #tpu.pipeline_mode<synchronous>, transform_indices = @transform_3, window_bounds = array<i64: 128, 128>}, {pipeline_mode = #tpu.pipeline_mode<synchronous>, transform_indices = @transform_4, window_bounds = array<i64: 1, 128>}, {transform_indices = @transform_5, window_bounds = array<i64: 16, 128>}]} {
    %c0 = arith.constant 0 : index
    %c0_0 = arith.constant 0 : index
    %0 = vector.load %arg1[%c0, %c0_0] : memref<16x128xf32, #tpu.memory_space<vmem>>, vector<16x128xf32>
    %1 = arith.truncf %0 : vector<16x128xf32> to vector<16x128xbf16>
    %c0_1 = arith.constant 0 : index
    %c0_2 = arith.constant 0 : index
    %2 = vector.load %arg2[%c0_1, %c0_2] : memref<128x128xbf16, #tpu.memory_space<vmem>>, vector<128x128xbf16>
    %cst = arith.constant dense<0.000000e+00> : vector<16x128xf32>
    %3 = tpu.matmul %1, %2, %cst {dimension_numbers = #tpu.dot_dimension_numbers<[1], [0], [0], [1], [0, 0, 1, 1], [], []>} : vector<16x128xbf16>, vector<128x128xbf16>, vector<16x128xf32> -> vector<16x128xf32>
    %c0_3 = arith.constant 0 : index
    %c0_4 = arith.constant 0 : index
    %4 = vector.load %arg3[%c0_3, %c0_4] : memref<1x128xf32, #tpu.memory_space<vmem>>, vector<1x128xf32>
    %5 = vector.broadcast %4 : vector<1x128xf32> to vector<16x128xf32>
    %6 = arith.addf %3, %5 : vector<16x128xf32>
    %cst_5 = arith.constant 0.000000e+00 : f32
    %7 = vector.broadcast %cst_5 : f32 to vector<16x128xf32>
    %8 = arith.maximumf %6, %7 : vector<16x128xf32>
    %9 = arith.truncf %8 : vector<16x128xf32> to vector<16x128xbf16>
    %c0_6 = arith.constant 0 : index
    %c0_7 = arith.constant 0 : index
    %10 = vector.load %arg4[%c0_6, %c0_7] : memref<128x128xbf16, #tpu.memory_space<vmem>>, vector<128x128xbf16>
    %cst_8 = arith.constant dense<0.000000e+00> : vector<16x128xf32>
    %11 = tpu.matmul %9, %10, %cst_8 {dimension_numbers = #tpu.dot_dimension_numbers<[1], [0], [0], [1], [0, 0, 1, 1], [], []>} : vector<16x128xbf16>, vector<128x128xbf16>, vector<16x128xf32> -> vector<16x128xf32>
    %c0_9 = arith.constant 0 : index
    %c0_10 = arith.constant 0 : index
    %12 = vector.load %arg5[%c0_9, %c0_10] : memref<1x128xf32, #tpu.memory_space<vmem>>, vector<1x128xf32>
    %13 = vector.broadcast %12 : vector<1x128xf32> to vector<16x128xf32>
    %14 = arith.addf %11, %13 : vector<16x128xf32>
    %cst_11 = arith.constant 0.000000e+00 : f32
    %15 = vector.broadcast %cst_11 : f32 to vector<16x128xf32>
    %16 = arith.maximumf %14, %15 : vector<16x128xf32>
    %17 = arith.truncf %16 : vector<16x128xf32> to vector<16x128xbf16>
    %c0_12 = arith.constant 0 : index
    %c0_13 = arith.constant 0 : index
    %18 = vector.load %arg6[%c0_12, %c0_13] : memref<16x128xbf16, #tpu.memory_space<vmem>>, vector<16x128xbf16>
    tpu.vector_store %arg6[%c0_12, %c0_13], %17 {strides = array<i32>} : memref<16x128xbf16, #tpu.memory_space<vmem>>, vector<16x128xbf16>,
    return
  }
  func.func @transform_0(%arg0: i32) -> (i32, i32) {
    %c0_i32 = arith.constant 0 : i32
    %c0_i32_0 = arith.constant 0 : i32
    return %arg0, %c0_i32 : i32, i32
  }
  func.func @transform_1(%arg0: i32) -> (i32, i32) {
    %c0_i32 = arith.constant 0 : i32
    %c0_i32_0 = arith.constant 0 : i32
    %c0_i32_1 = arith.constant 0 : i32
    return %c0_i32, %c0_i32_0 : i32, i32
  }
  func.func @transform_2(%arg0: i32) -> (i32, i32) {
    %c0_i32 = arith.constant 0 : i32
    %c0_i32_0 = arith.constant 0 : i32
    %c0_i32_1 = arith.constant 0 : i32
    return %c0_i32, %c0_i32_0 : i32, i32
  }
  func.func @transform_3(%arg0: i32) -> (i32, i32) {
    %c0_i32 = arith.constant 0 : i32
    %c0_i32_0 = arith.constant 0 : i32
    %c0_i32_1 = arith.constant 0 : i32
    return %c0_i32, %c0_i32_0 : i32, i32
  }
  func.func @transform_4(%arg0: i32) -> (i32, i32) {
    %c0_i32 = arith.constant 0 : i32
    %c0_i32_0 = arith.constant 0 : i32
    %c0_i32_1 = arith.constant 0 : i32
    return %c0_i32, %c0_i32_0 : i32, i32
  }
  func.func @transform_5(%arg0: i32) -> (i32, i32) {
    %c0_i32 = arith.constant 0 : i32
    %c0_i32_0 = arith.constant 0 : i32
    return %arg0, %c0_i32 : i32, i32
  }
}

</mosaic_0001>

<bundles_post_ra>
// kernel: tpu_custom_call.1
= control target key start
LH: loop header
LB: loop body
LE: loop exit
PB: predicated region body
PF: predicated region fallthrough
CT: control target
= control target key end

     0   :  { %10 = vsyncpa [#allocation3], 0  ;;  %s631_s0 = inlined_call_operand.hbm [shape: f32[16,128], index: 0, kind: input, shape index: {}]   ;;  %s632_s1 = inlined_call_operand.hbm [shape: bf16[128,128], index: 1, kind: input, shape index: {}]   ;;  %s633_s2 = inlined_call_operand.vmem [shape: f32[1,128], index: 2, kind: input, shape index: {}]   ;;  %s634_s3 = inlined_call_operand.hbm [shape: bf16[128,128], index: 3, kind: input, shape index: {}]   ;;  %s635_s4 = inlined_call_operand.vmem [shape: f32[1,128], index: 4, kind: input, shape index: {}]   ;;  %s636_s5 = inlined_call_operand.hbm [shape: bf16[16,128], index: 5, kind: output, shape index: {}]  }
   0x1   :  { %11 = vsyncpa [#allocation6], 0 }
   0x2   :  { %12 = vsyncpa [#allocation4], 0  ;;  %s528_s18 = smov [#allocation5]   ;;  %s434_s22 = scalar_lea.hbm %s632_s1, 1024 }
   0x3   :  { %s30_s19 = sshll.u32 %s528_s18, 4  ;;  %p435_p0 = scmp.ne.s32.totalorder %s632_s1, %s434_s22  ;;  %s31_s19 = int_to_ptr.vmem [resolvable:$true] %s30_s19 }
   0x4   :  { %p438_p1 = scmp.lt.u32.totalorder %s434_s22, %s632_s1 }
   0x6   :  { %p440_p2 = pnand %p438_p1, %p435_p0 }
   0x8   :  { %443 = shalt.err (!%p440_p2)
}
   0x9   :  { %s444_s27 = scalar_lea.vmem %s31_s19, 1024  ;;  %p449_p4 = scmp.lt.s32.totalorder %s31_s19, %s31_s19 }
   0xa   :  { %p445_p3 = scmp.ne.s32.totalorder %s31_s19, %s444_s27  ;;  %p450_p5 = scmp.lt.s32.totalorder %s444_s27, %s444_s27 }
   0xc   :  { %p451_p6 = por %p450_p5, %p449_p4 }
   0xe   :  { %p452_p7 = pnand %p451_p6, %p445_p3 }
  0x10   :  { %455 = shalt.err (!%p452_p7)
}
  0x11   :  { %s529_s28 = smov 64   ;;  %s530_s29 = smov 4  }
  0x12   :  { %36 = dma.hbm_to_vmem [thread:$0]  %s632_s1, 1024, %s31_s19, [#allocation6], %s529_s28, %s529_s28, %s530_s29  }
  0x13   :  { %s531_s7 = smov [#allocation2]   ;;  %s456_s11 = scalar_lea.hbm %s631_s0, 256 }
  0x14   :  { %s18_s8 = sshll.u32 %s531_s7, 4  ;;  %p457_p8 = scmp.ne.s32.totalorder %s631_s0, %s456_s11  ;;  %s19_s8 = int_to_ptr.vmem [resolvable:$true] %s18_s8 }
  0x15   :  { %p460_p9 = scmp.lt.u32.totalorder %s456_s11, %s631_s0 }
  0x17   :  { %p462_p10 = pnand %p460_p9, %p457_p8 }
  0x19   :  { %465 = shalt.err (!%p462_p10)
}
  0x1a   :  { %s466_s16 = scalar_lea.vmem %s19_s8, 256  ;;  %p471_p12 = scmp.lt.s32.totalorder %s19_s8, %s19_s8 }
  0x1b   :  { %p467_p11 = scmp.ne.s32.totalorder %s19_s8, %s466_s16  ;;  %p472_p13 = scmp.lt.s32.totalorder %s466_s16, %s466_s16 }
  0x1d   :  { %p473_p0 = por %p472_p13, %p471_p12 }
  0x1f   :  { %p474_p1 = pnand %p473_p0, %p467_p11 }
  0x21   :  { %477 = shalt.err (!%p474_p1)
}
  0x22   :  { %s532_s1 = smov 128   ;;  %s533_s17 = smov 8  }
  0x23   :  { %24 = dma.hbm_to_vmem [thread:$0]  %s631_s0, 256, %s19_s8, [#allocation3], %s532_s1, %s532_s1, %s533_s17  }
  0x24   :  { %s534_s20 = smov [#allocation7]   ;;  %s478_s24 = scalar_lea.hbm %s634_s3, 1024 }
  0x25   :  { %s44_s21 = sshll.u32 %s534_s20, 4  ;;  %p479_p2 = scmp.ne.s32.totalorder %s634_s3, %s478_s24  ;;  %s45_s21 = int_to_ptr.vmem [resolvable:$true] %s44_s21 }
  0x26   :  { %p482_p3 = scmp.lt.u32.totalorder %s478_s24, %s634_s3 }
  0x28   :  { %p484_p4 = pnand %p482_p3, %p479_p2 }
  0x2a   :  { %487 = shalt.err (!%p484_p4)
}
  0x2b   :  { %s488_s6 = scalar_lea.vmem %s45_s21, 1024  ;;  %p493_p6 = scmp.lt.s32.totalorder %s45_s21, %s45_s21 }
  0x2c   :  { %p489_p5 = scmp.ne.s32.totalorder %s45_s21, %s488_s6  ;;  %p494_p7 = scmp.lt.s32.totalorder %s488_s6, %s488_s6 }
  0x2e   :  { %p495_p8 = por %p494_p7, %p493_p6 }
  0x30   :  { %p496_p9 = pnand %p495_p8, %p489_p5 }
  0x32   :  { %499 = shalt.err (!%p496_p9)
}
  0x33   :  { %50 = dma.hbm_to_vmem [thread:$0]  %s634_s3, 1024, %s45_s21, [#allocation6], %s529_s28, %s529_s28, %s530_s29  }
  0x34   :  { %522 = dma.done.wait [#allocation3], 256  }
  0x35   :  { %523 = vsyncadd [#allocation3], 4294967040 }
  0x36   :  { %524 = dma.done.wait [#allocation6], 2048  }
  0x37   :  { %525 = vsyncadd [#allocation6], 4294965248  ;;  %v535_v0 = vmov 0.0   ;;  %vm536_vm0 = vmmov 0   ;;  %v418_v1 = vld [vmem:[#allocation5] sm:$0xff]   ;;  %v419_v2 = vld [vmem:[#allocation5 + $0x8] sm:$0xff]  }
  0x38   :  { %368 = vmatprep.subr.bf16.mxu0 %v535_v0  ;;  %384 = vmatprep.mubr.msk.bf16.mxu0 %vm536_vm0, %v535_v0  ;;  %v420_v3 = vld [vmem:[#allocation5 + $0x10] sm:$0xff]   ;;  %v426_v4 = vld [vmem:[#allocation7] sm:$0xff]   ;;  %v421_v5 = vld [vmem:[#allocation5 + $0x18] sm:$0xff]  }
  0x39   :  { %388 = vmatprep.subr.bf16.mxu1 %v535_v0  ;;  %404 = vmatprep.mubr.msk.bf16.mxu1 %vm536_vm0, %v535_v0  ;;  %v427_v6 = vld [vmem:[#allocation7 + $0x8] sm:$0xff]   ;;  %v422_v7 = vld [vmem:[#allocation5 + $0x20] sm:$0xff]   ;;  %v428_v8 = vld [vmem:[#allocation7 + $0x10] sm:$0xff]  }
  0x3a   :  { %369 = vmatpush3.bf16.msra.mxu0 %v418_v1  ;;  %389 = vmatpush3.bf16.msra.mxu1 %v426_v4  ;;  %v423_v9 = vld [vmem:[#allocation5 + $0x28] sm:$0xff]   ;;  %v429_v10 = vld [vmem:[#allocation7 + $0x18] sm:$0xff]   ;;  %v424_v11 = vld [vmem:[#allocation5 + $0x30] sm:$0xff]  }
  0x3b   :  { %370 = vmatprep.subr.bf16.mxu0 %v535_v0  ;;  %390 = vmatprep.subr.bf16.mxu1 %v535_v0  ;;  %v430_v12 = vld [vmem:[#allocation7 + $0x20] sm:$0xff]   ;;  %v425_v13 = vld [vmem:[#allocation5 + $0x38] sm:$0xff]   ;;  %v63_v14 = vld [vmem:[#allocation2] sm:$0xff] }
  0x3c   :  { %v64_v15 = vld [vmem:[#allocation2 + $0x8] sm:$0xff]  ;;  %v431_v16 = vld [vmem:[#allocation7 + $0x28] sm:$0xff]   ;;  %v432_v18 = vld [vmem:[#allocation7 + $0x30] sm:$0xff]  }
  0x3d   :  { %v65_v17 = vpack.c.bf16 %v64_v15, %v63_v14  ;;  %v433_v19 = vld [vmem:[#allocation7 + $0x38] sm:$0xff]   ;;  %v323_v20 = vld [vmem:[%s633_s2] ss:$0 sm:$0xff]  ;;  %s537_s2 = smov [#allocation8]  }
  0x3e   :  { %371 = vmatpush3.bf16.msra.mxu0 %v419_v2  ;;  %391 = vmatpush3.bf16.msra.mxu1 %v427_v6  ;;  %v332_v30 = vld [vmem:[%s635_s4] ss:$0 sm:$0xff]  ;;  %s310_s11 = sshll.u32 %s537_s2, 4  ;;  %s311_s11 = int_to_ptr.vmem [resolvable:$true] %s310_s11 }
  0x3f   :  { %372 = vmatprep.subr.bf16.mxu0 %v535_v0  ;;  %392 = vmatprep.subr.bf16.mxu1 %v535_v0  ;;  %s500_s12 = scalar_lea.vmem %s311_s11, 128  ;;  %p505_p11 = scmp.lt.s32.totalorder %s311_s11, %s311_s11 }
  0x40   :  { %p501_p10 = scmp.ne.s32.totalorder %s311_s11, %s500_s12  ;;  %p506_p12 = scmp.lt.s32.totalorder %s500_s12, %s500_s12 }
  0x42   :  { %373 = vmatpush3.bf16.msra.mxu0 %v420_v3  ;;  %393 = vmatpush3.bf16.msra.mxu1 %v428_v8  ;;  %p507_p13 = por %p506_p12, %p505_p11 }
  0x43   :  { %374 = vmatprep.subr.bf16.mxu0 %v535_v0  ;;  %394 = vmatprep.subr.bf16.mxu1 %v535_v0 }
  0x44   :  { %p508_p0 = pnand %p507_p13, %p501_p10 }
  0x46   :  { %375 = vmatpush3.bf16.msra.mxu0 %v421_v5  ;;  %395 = vmatpush3.bf16.msra.mxu1 %v429_v10 }
  0x47   :  { %376 = vmatprep.subr.bf16.mxu0 %v535_v0  ;;  %396 = vmatprep.subr.bf16.mxu1 %v535_v0 }
  0x4a   :  { %377 = vmatpush3.bf16.msra.mxu0 %v422_v7  ;;  %397 = vmatpush3.bf16.msra.mxu1 %v430_v12 }
  0x4b   :  { %378 = vmatprep.subr.bf16.mxu0 %v535_v0  ;;  %398 = vmatprep.subr.bf16.mxu1 %v535_v0 }
  0x4e   :  { %379 = vmatpush3.bf16.msra.mxu0 %v423_v9  ;;  %399 = vmatpush3.bf16.msra.mxu1 %v431_v16 }
  0x4f   :  { %380 = vmatprep.subr.bf16.mxu0 %v535_v0  ;;  %400 = vmatprep.subr.bf16.mxu1 %v535_v0 }
  0x52   :  { %381 = vmatpush3.bf16.msra.mxu0 %v424_v11  ;;  %401 = vmatpush3.bf16.msra.mxu1 %v432_v18 }
  0x53   :  { %382 = vmatprep.subr.bf16.mxu0 %v535_v0  ;;  %402 = vmatprep.subr.bf16.mxu1 %v535_v0 }
  0x56   :  { %383 = vmatpush3.bf16.msra.mxu0 %v425_v13  ;;  %403 = vmatpush3.bf16.msra.mxu1 %v433_v19 }
  0x59   :  { %385 = vmatmul.mubr.bf16.vlgmr.msra.gmra.mrb[0].mxu0 %v65_v17 }
 0x12c   :  { %v171_v21 = vpop.f32.mrb[0].mxu0 }
 0x12d   :  { %v172_v22 = vadd.f32 %v323_v20, %v171_v21  ;;  %v386_v23 = vpop.f32.mrb[1].mxu0 }
 0x12e   :  { %v174_v24 = vpop.f32.mrb[2].mxu0 }
 0x12f   :  { %v175_v25 = vadd.f32 %v323_v20, %v174_v24  ;;  %v387_v26 = vpop.f32.mrb[3].mxu0  ;;  %v178_v27 = vmax.f32 %v172_v22, 0.0 }
 0x131   :  { %v179_v28 = vmax.f32 %v175_v25, 0.0 }
 0x133   :  { %v180_v29 = vpack.c.bf16 %v179_v28, %v178_v27 }
 0x135   :  { %405 = vmatmul.mubr.bf16.vlgmr.msra.gmra.mrb[0].mxu1 %v180_v29 }
 0x208   :  { %v286_v31 = vpop.f32.mrb[0].mxu1 }
 0x209   :  { %v287_v32 = vadd.f32 %v332_v30, %v286_v31  ;;  %v406_v33 = vpop.f32.mrb[1].mxu1 }
 0x20a   :  { %v289_v34 = vpop.f32.mrb[2].mxu1 }
 0x20b   :  { %v290_v35 = vadd.f32 %v332_v30, %v289_v34  ;;  %v407_v36 = vpop.f32.mrb[3].mxu1  ;;  %v293_v37 = vmax.f32 %v287_v32, 0.0 }
 0x20d   :  { %v294_v38 = vmax.f32 %v290_v35, 0.0 }
 0x20f   :  { %v348_v39 = vpack.c.bf16 %v294_v38, %v293_v37 }
 0x211   :  { %349 = vst [vmem:[#allocation8] sm:$0xff] %v348_v39  }
 0x212   :  { %511 = shalt.err (!%p508_p0)
}
 0x213   :  { %s512_s14 = scalar_lea.hbm %s636_s5, 128 }
 0x214   :  { %p513_p1 = scmp.ne.s32.totalorder %s636_s5, %s512_s14  ;;  %p516_p2 = scmp.lt.u32.totalorder %s512_s14, %s636_s5 }
 0x216   :  { %p518_p3 = pnand %p516_p2, %p513_p1 }
 0x218   :  { %521 = shalt.err (!%p518_p3)
}
 0x219   :  { %316 = dma.vmem_to_hbm [thread:$0]  %s311_s11, 128, %s636_s5, [#allocation4], %s529_s28, %s529_s28, %s530_s29  }
 0x21a   :  { %526 = dma.done.wait [#allocation4], 128  }
 0x21b   :  { %527 = vsyncadd [#allocation4], 4294967168 }
 0x21c   :  { %320 = vsyncpa [#allocation3], 1 }
 0x21d   :  { %321 = vsyncpa [#allocation6], 1 }
 0x21e   :  { %322 = vsyncpa [#allocation4], 1 }

</bundles_post_ra>
